<compile_context>
chip_gen: v6e
topology: v6e:2x2x1
jax: 0.10.0
libtpu: 0.0.40
codegen_flags: <defaults>
</compile_context>

<pallas_src>
import functools

import jax
import jax.numpy as jnp
from jax.experimental import pallas as pl
from jax.experimental.pallas import tpu as pltpu


def _layernorm_channels_kernel(g_ref, b_ref, x_ref, o_ref, *, eps):
    """g_ref/b_ref: (C,) f32 in SMEM.  x_ref/o_ref: (Nb, C, Sb, L) VMEM tiles.

    The block always carries the FULL channel dim C, so the statistics below
    are exact (see wrapper: C is never blocked).
    """
    C = x_ref.shape[1]
    inv_c = jnp.float32(1.0 / C)

    # Pass 1: per-pixel mean over channels — unrolled dense-slab VPU adds.
    total = x_ref[:, 0, :, :].astype(jnp.float32)
    for c in range(1, C):
        total = total + x_ref[:, c, :, :].astype(jnp.float32)
    mean = total * inv_c                                      # (Nb, Sb, L)

    # Pass 2: biased variance (reload slabs instead of keeping C live copies).
    d = x_ref[:, 0, :, :].astype(jnp.float32) - mean
    ssq = d * d
    for c in range(1, C):
        d = x_ref[:, c, :, :].astype(jnp.float32) - mean
        ssq = ssq + d * d
    inv_std = jax.lax.rsqrt(ssq * inv_c + jnp.float32(eps))   # EUP rsqrt

    # Pass 3: normalize + per-channel affine with SMEM scalars.
    for c in range(C):
        xc = x_ref[:, c, :, :].astype(jnp.float32) - mean
        y = xc * (inv_std * g_ref[c]) + b_ref[c]
        o_ref[:, c, :, :] = y.astype(o_ref.dtype)


def _largest_divisor_leq(n, cap):
    cap = max(1, min(n, cap))
    for d in range(cap, 0, -1):
        if n % d == 0:
            return d
    return 1


def layernorm_channels(x, gamma, beta, *, eps=1e-5,
                       target_block_bytes=2 * 1024 * 1024):
    """LayerNorm over the channel axis of x: (N, C, *spatial).

    gamma, beta: (C,).  Returns an array with x's shape and dtype.
    """
    N, C = int(x.shape[0]), int(x.shape[1])
    HW = 1
    for s in x.shape[2:]:
        HW *= int(s)
    assert gamma.shape == (C,) and beta.shape == (C,)

    # Lane-dense layout: (N, C, S, L), a free view of contiguous NCHW input.
    if HW % 128 == 0:
        L = 128
        S = HW // 128
    else:
        # TODO(synk): spatial sizes not divisible by 128 fall back to a single
        # (possibly masked) lane block; pad HW in the wrapper if this path ever
        # matters for performance.
        L = HW
        S = 1

    itemsize = jnp.dtype(x.dtype).itemsize
    image_bytes = C * S * L * itemsize          # one full image (all channels)

    if image_bytes <= target_block_bytes:
        # Whole images per step; pack as many as fit the target block size.
        Sb = S
        Nb = _largest_divisor_leq(N, target_block_bytes // image_bytes)
    else:
        # One image already exceeds the target: tile the spatial axis in
        # sublane-aligned (multiple-of-8) chunks that divide S.
        Nb = 1
        cap = max(1, target_block_bytes // (C * L * itemsize))
        Sb = S
        best = None
        for d in range(8, min(S, cap) + 1, 8):
            if S % d == 0:
                best = d
        if best is not None:
            Sb = best
        # else: no aligned divisor — keep the full (oversized) spatial extent;
        # still correct, may need a larger VMEM limit for extreme shapes.

    x4 = x.reshape(N, C, S, L)                  # free view
    g = gamma.reshape(C).astype(jnp.float32)
    b = beta.reshape(C).astype(jnp.float32)

    kernel = functools.partial(_layernorm_channels_kernel, eps=eps)
    grid = (N // Nb, S // Sb)

    y4 = pl.pallas_call(
        kernel,
        out_shape=jax.ShapeDtypeStruct((N, C, S, L), x.dtype),
        grid=grid,
        in_specs=[
            pl.BlockSpec(memory_space=pltpu.MemorySpace.SMEM),   # gamma (C,)
            pl.BlockSpec(memory_space=pltpu.MemorySpace.SMEM),   # beta  (C,)
            # Channel dim is never blocked (full C): required for exact stats.
            pl.BlockSpec((Nb, C, Sb, L), lambda i, j: (i, 0, j, 0)),
        ],
        out_specs=pl.BlockSpec((Nb, C, Sb, L), lambda i, j: (i, 0, j, 0)),
        compiler_params=pltpu.CompilerParams(
            dimension_semantics=("parallel", "parallel")),
    )(g, b, x4)

    return y4.reshape(x.shape)


def _reference(x, gamma, beta, eps=1e-5):
    """Pure-JAX reference of LayerNormChannels.forward (transpose -> LN -> transpose)."""
    xt = jnp.swapaxes(x, 1, -1).astype(jnp.float32)
    mean = jnp.mean(xt, axis=-1, keepdims=True)
    var = jnp.mean(jnp.square(xt - mean), axis=-1, keepdims=True)
    y = (xt - mean) / jnp.sqrt(var + eps) * gamma + beta
    return jnp.swapaxes(y, 1, -1).astype(x.dtype)


if __name__ == "__main__":
    # Small shapes consistent with the module usage: batch=2, channels=4, 16x16 spatial.
    N, C, H, W = 2, 4, 16, 16

    key = jax.random.PRNGKey(0)
    kx, kg, kb = jax.random.split(key, 3)
    x = jax.random.normal(kx, (N, C, H, W), dtype=jnp.float32)
    # nn.LayerNorm initializes gamma=1, beta=0; perturb them so the affine path is exercised.
    gamma = 1.0 + 0.1 * jax.random.normal(kg, (C,), dtype=jnp.float32)
    beta = 0.1 * jax.random.normal(kb, (C,), dtype=jnp.float32)

    y = jax.block_until_ready(layernorm_channels(x, gamma, beta))
    y_ref = jax.block_until_ready(_reference(x, gamma, beta))

    assert y.shape == x.shape and y.dtype == x.dtype
    assert jnp.allclose(y, y_ref, atol=1e-5, rtol=1e-5), "mismatch vs reference LayerNorm"
    print("KERNEL_OK")
</pallas_src>

<mosaic_0001>
module attributes {stable_mosaic.version = 11 : i64} {
  func.func @_layernorm_channels_kernel(%arg0: i32, %arg1: i32, %arg2: memref<4xf32, #tpu.memory_space<smem>>, %arg3: memref<4xf32, #tpu.memory_space<smem>>, %arg4: memref<2x4x2x128xf32, #tpu.memory_space<vmem>>, %arg5: memref<2x4x2x128xf32, #tpu.memory_space<vmem>>) attributes {dimension_semantics = [#tpu.dimension_semantics<parallel>, #tpu.dimension_semantics<parallel>], iteration_bounds = array<i64: 1, 1>, scalar_prefetch = 0 : i64, scratch_operands = 0 : i64, tpu.core_type = #tpu.core_type<tc>, window_params = [{transform_indices = @transform_0, window_bounds = array<i64: 4>}, {transform_indices = @transform_1, window_bounds = array<i64: 4>}, {transform_indices = @transform_2, window_bounds = array<i64: 2, 4, 2, 128>}, {transform_indices = @transform_3, window_bounds = array<i64: 2, 4, 2, 128>}]} {
    %c0 = arith.constant 0 : index
    %c0_0 = arith.constant 0 : index
    %c0_1 = arith.constant 0 : index
    %c0_2 = arith.constant 0 : index
    %0 = vector.load %arg4[%c0, %c0_0, %c0_1, %c0_2] : memref<2x4x2x128xf32, #tpu.memory_space<vmem>>, vector<2x1x2x128xf32>
    %1 = vector.shape_cast %0 : vector<2x1x2x128xf32> to vector<2x2x128xf32>
    %c0_3 = arith.constant 0 : index
    %c1 = arith.constant 1 : index
    %c0_4 = arith.constant 0 : index
    %c0_5 = arith.constant 0 : index
    %2 = vector.load %arg4[%c0_3, %c1, %c0_4, %c0_5] : memref<2x4x2x128xf32, #tpu.memory_space<vmem>>, vector<2x1x2x128xf32>
    %3 = vector.shape_cast %2 : vector<2x1x2x128xf32> to vector<2x2x128xf32>
    %4 = arith.addf %1, %3 : vector<2x2x128xf32>
    %c0_6 = arith.constant 0 : index
    %c2 = arith.constant 2 : index
    %c0_7 = arith.constant 0 : index
    %c0_8 = arith.constant 0 : index
    %5 = vector.load %arg4[%c0_6, %c2, %c0_7, %c0_8] : memref<2x4x2x128xf32, #tpu.memory_space<vmem>>, vector<2x1x2x128xf32>
    %6 = vector.shape_cast %5 : vector<2x1x2x128xf32> to vector<2x2x128xf32>
    %7 = arith.addf %4, %6 : vector<2x2x128xf32>
    %c0_9 = arith.constant 0 : index
    %c3 = arith.constant 3 : index
    %c0_10 = arith.constant 0 : index
    %c0_11 = arith.constant 0 : index
    %8 = vector.load %arg4[%c0_9, %c3, %c0_10, %c0_11] : memref<2x4x2x128xf32, #tpu.memory_space<vmem>>, vector<2x1x2x128xf32>
    %9 = vector.shape_cast %8 : vector<2x1x2x128xf32> to vector<2x2x128xf32>
    %10 = arith.addf %7, %9 : vector<2x2x128xf32>
    %cst = arith.constant 2.500000e-01 : f32
    %11 = vector.broadcast %cst : f32 to vector<2x2x128xf32>
    %12 = arith.mulf %10, %11 : vector<2x2x128xf32>
    %c0_12 = arith.constant 0 : index
    %c0_13 = arith.constant 0 : index
    %c0_14 = arith.constant 0 : index
    %c0_15 = arith.constant 0 : index
    %13 = vector.load %arg4[%c0_12, %c0_13, %c0_14, %c0_15] : memref<2x4x2x128xf32, #tpu.memory_space<vmem>>, vector<2x1x2x128xf32>
    %14 = vector.shape_cast %13 : vector<2x1x2x128xf32> to vector<2x2x128xf32>
    %15 = arith.subf %14, %12 : vector<2x2x128xf32>
    %16 = arith.mulf %15, %15 : vector<2x2x128xf32>
    %c0_16 = arith.constant 0 : index
    %c1_17 = arith.constant 1 : index
    %c0_18 = arith.constant 0 : index
    %c0_19 = arith.constant 0 : index
    %17 = vector.load %arg4[%c0_16, %c1_17, %c0_18, %c0_19] : memref<2x4x2x128xf32, #tpu.memory_space<vmem>>, vector<2x1x2x128xf32>
    %18 = vector.shape_cast %17 : vector<2x1x2x128xf32> to vector<2x2x128xf32>
    %19 = arith.subf %18, %12 : vector<2x2x128xf32>
    %20 = arith.mulf %19, %19 : vector<2x2x128xf32>
    %21 = arith.addf %16, %20 : vector<2x2x128xf32>
    %c0_20 = arith.constant 0 : index
    %c2_21 = arith.constant 2 : index
    %c0_22 = arith.constant 0 : index
    %c0_23 = arith.constant 0 : index
    %22 = vector.load %arg4[%c0_20, %c2_21, %c0_22, %c0_23] : memref<2x4x2x128xf32, #tpu.memory_space<vmem>>, vector<2x1x2x128xf32>
    %23 = vector.shape_cast %22 : vector<2x1x2x128xf32> to vector<2x2x128xf32>
    %24 = arith.subf %23, %12 : vector<2x2x128xf32>
    %25 = arith.mulf %24, %24 : vector<2x2x128xf32>
    %26 = arith.addf %21, %25 : vector<2x2x128xf32>
    %c0_24 = arith.constant 0 : index
    %c3_25 = arith.constant 3 : index
    %c0_26 = arith.constant 0 : index
    %c0_27 = arith.constant 0 : index
    %27 = vector.load %arg4[%c0_24, %c3_25, %c0_26, %c0_27] : memref<2x4x2x128xf32, #tpu.memory_space<vmem>>, vector<2x1x2x128xf32>
    %28 = vector.shape_cast %27 : vector<2x1x2x128xf32> to vector<2x2x128xf32>
    %29 = arith.subf %28, %12 : vector<2x2x128xf32>
    %30 = arith.mulf %29, %29 : vector<2x2x128xf32>
    %31 = arith.addf %26, %30 : vector<2x2x128xf32>
    %cst_28 = arith.constant 2.500000e-01 : f32
    %32 = vector.broadcast %cst_28 : f32 to vector<2x2x128xf32>
    %33 = arith.mulf %31, %32 : vector<2x2x128xf32>
    %cst_29 = arith.constant 9.99999974E-6 : f32
    %34 = vector.broadcast %cst_29 : f32 to vector<2x2x128xf32>
    %35 = arith.addf %33, %34 : vector<2x2x128xf32>
    %36 = math.rsqrt %35 : vector<2x2x128xf32>
    %c0_30 = arith.constant 0 : index
    %c0_31 = arith.constant 0 : index
    %c0_32 = arith.constant 0 : index
    %c0_33 = arith.constant 0 : index
    %37 = vector.load %arg4[%c0_30, %c0_31, %c0_32, %c0_33] : memref<2x4x2x128xf32, #tpu.memory_space<vmem>>, vector<2x1x2x128xf32>
    %38 = vector.shape_cast %37 : vector<2x1x2x128xf32> to vector<2x2x128xf32>
    %39 = arith.subf %38, %12 : vector<2x2x128xf32>
    %c0_34 = arith.constant 0 : index
    %40 = memref.load %arg2[%c0_34] : memref<4xf32, #tpu.memory_space<smem>>
    %41 = vector.broadcast %40 : f32 to vector<2x2x128xf32>
    %42 = arith.mulf %36, %41 : vector<2x2x128xf32>
    %43 = arith.mulf %39, %42 : vector<2x2x128xf32>
    %c0_35 = arith.constant 0 : index
    %44 = memref.load %arg3[%c0_35] : memref<4xf32, #tpu.memory_space<smem>>
    %45 = vector.broadcast %44 : f32 to vector<2x2x128xf32>
    %46 = arith.addf %43, %45 : vector<2x2x128xf32>
    %c0_36 = arith.constant 0 : index
    %c0_37 = arith.constant 0 : index
    %c0_38 = arith.constant 0 : index
    %c0_39 = arith.constant 0 : index
    %47 = vector.load %arg5[%c0_36, %c0_37, %c0_38, %c0_39] : memref<2x4x2x128xf32, #tpu.memory_space<vmem>>, vector<2x1x2x128xf32>
    %48 = vector.shape_cast %47 : vector<2x1x2x128xf32> to vector<2x2x128xf32>
    %49 = vector.shape_cast %46 : vector<2x2x128xf32> to vector<2x1x2x128xf32>
    tpu.vector_store %arg5[%c0_36, %c0_37, %c0_38, %c0_39], %49 {strides = array<i32>} : memref<2x4x2x128xf32, #tpu.memory_space<vmem>>, vector<2x1x2x128xf32>,
    %c0_40 = arith.constant 0 : index
    %c1_41 = arith.constant 1 : index
    %c0_42 = arith.constant 0 : index
    %c0_43 = arith.constant 0 : index
    %50 = vector.load %arg4[%c0_40, %c1_41, %c0_42, %c0_43] : memref<2x4x2x128xf32, #tpu.memory_space<vmem>>, vector<2x1x2x128xf32>
    %51 = vector.shape_cast %50 : vector<2x1x2x128xf32> to vector<2x2x128xf32>
    %52 = arith.subf %51, %12 : vector<2x2x128xf32>
    %c1_44 = arith.constant 1 : index
    %53 = memref.load %arg2[%c1_44] : memref<4xf32, #tpu.memory_space<smem>>
    %54 = vector.broadcast %53 : f32 to vector<2x2x128xf32>
    %55 = arith.mulf %36, %54 : vector<2x2x128xf32>
    %56 = arith.mulf %52, %55 : vector<2x2x128xf32>
    %c1_45 = arith.constant 1 : index
    %57 = memref.load %arg3[%c1_45] : memref<4xf32, #tpu.memory_space<smem>>
    %58 = vector.broadcast %57 : f32 to vector<2x2x128xf32>
    %59 = arith.addf %56, %58 : vector<2x2x128xf32>
    %c0_46 = arith.constant 0 : index
    %c1_47 = arith.constant 1 : index
    %c0_48 = arith.constant 0 : index
    %c0_49 = arith.constant 0 : index
    %60 = vector.load %arg5[%c0_46, %c1_47, %c0_48, %c0_49] : memref<2x4x2x128xf32, #tpu.memory_space<vmem>>, vector<2x1x2x128xf32>
    %61 = vector.shape_cast %60 : vector<2x1x2x128xf32> to vector<2x2x128xf32>
    %62 = vector.shape_cast %59 : vector<2x2x128xf32> to vector<2x1x2x128xf32>
    tpu.vector_store %arg5[%c0_46, %c1_47, %c0_48, %c0_49], %62 {strides = array<i32>} : memref<2x4x2x128xf32, #tpu.memory_space<vmem>>, vector<2x1x2x128xf32>,
    %c0_50 = arith.constant 0 : index
    %c2_51 = arith.constant 2 : index
    %c0_52 = arith.constant 0 : index
    %c0_53 = arith.constant 0 : index
    %63 = vector.load %arg4[%c0_50, %c2_51, %c0_52, %c0_53] : memref<2x4x2x128xf32, #tpu.memory_space<vmem>>, vector<2x1x2x128xf32>
    %64 = vector.shape_cast %63 : vector<2x1x2x128xf32> to vector<2x2x128xf32>
    %65 = arith.subf %64, %12 : vector<2x2x128xf32>
    %c2_54 = arith.constant 2 : index
    %66 = memref.load %arg2[%c2_54] : memref<4xf32, #tpu.memory_space<smem>>
    %67 = vector.broadcast %66 : f32 to vector<2x2x128xf32>
    %68 = arith.mulf %36, %67 : vector<2x2x128xf32>
    %69 = arith.mulf %65, %68 : vector<2x2x128xf32>
    %c2_55 = arith.constant 2 : index
    %70 = memref.load %arg3[%c2_55] : memref<4xf32, #tpu.memory_space<smem>>
    %71 = vector.broadcast %70 : f32 to vector<2x2x128xf32>
    %72 = arith.addf %69, %71 : vector<2x2x128xf32>
    %c0_56 = arith.constant 0 : index
    %c2_57 = arith.constant 2 : index
    %c0_58 = arith.constant 0 : index
    %c0_59 = arith.constant 0 : index
    %73 = vector.load %arg5[%c0_56, %c2_57, %c0_58, %c0_59] : memref<2x4x2x128xf32, #tpu.memory_space<vmem>>, vector<2x1x2x128xf32>
    %74 = vector.shape_cast %73 : vector<2x1x2x128xf32> to vector<2x2x128xf32>
    %75 = vector.shape_cast %72 : vector<2x2x128xf32> to vector<2x1x2x128xf32>
    tpu.vector_store %arg5[%c0_56, %c2_57, %c0_58, %c0_59], %75 {strides = array<i32>} : memref<2x4x2x128xf32, #tpu.memory_space<vmem>>, vector<2x1x2x128xf32>,
    %c0_60 = arith.constant 0 : index
    %c3_61 = arith.constant 3 : index
    %c0_62 = arith.constant 0 : index
    %c0_63 = arith.constant 0 : index
    %76 = vector.load %arg4[%c0_60, %c3_61, %c0_62, %c0_63] : memref<2x4x2x128xf32, #tpu.memory_space<vmem>>, vector<2x1x2x128xf32>
    %77 = vector.shape_cast %76 : vector<2x1x2x128xf32> to vector<2x2x128xf32>
    %78 = arith.subf %77, %12 : vector<2x2x128xf32>
    %c3_64 = arith.constant 3 : index
    %79 = memref.load %arg2[%c3_64] : memref<4xf32, #tpu.memory_space<smem>>
    %80 = vector.broadcast %79 : f32 to vector<2x2x128xf32>
    %81 = arith.mulf %36, %80 : vector<2x2x128xf32>
    %82 = arith.mulf %78, %81 : vector<2x2x128xf32>
    %c3_65 = arith.constant 3 : index
    %83 = memref.load %arg3[%c3_65] : memref<4xf32, #tpu.memory_space<smem>>
    %84 = vector.broadcast %83 : f32 to vector<2x2x128xf32>
    %85 = arith.addf %82, %84 : vector<2x2x128xf32>
    %c0_66 = arith.constant 0 : index
    %c3_67 = arith.constant 3 : index
    %c0_68 = arith.constant 0 : index
    %c0_69 = arith.constant 0 : index
    %86 = vector.load %arg5[%c0_66, %c3_67, %c0_68, %c0_69] : memref<2x4x2x128xf32, #tpu.memory_space<vmem>>, vector<2x1x2x128xf32>
    %87 = vector.shape_cast %86 : vector<2x1x2x128xf32> to vector<2x2x128xf32>
    %88 = vector.shape_cast %85 : vector<2x2x128xf32> to vector<2x1x2x128xf32>
    tpu.vector_store %arg5[%c0_66, %c3_67, %c0_68, %c0_69], %88 {strides = array<i32>} : memref<2x4x2x128xf32, #tpu.memory_space<vmem>>, vector<2x1x2x128xf32>,
    return
  }
  func.func @transform_0(%arg0: i32, %arg1: i32) -> i32 {
    %c0_i32 = arith.constant 0 : i32
    %c0_i32_0 = arith.constant 0 : i32
    return %c0_i32 : i32
  }
  func.func @transform_1(%arg0: i32, %arg1: i32) -> i32 {
    %c0_i32 = arith.constant 0 : i32
    %c0_i32_0 = arith.constant 0 : i32
    return %c0_i32 : i32
  }
  func.func @transform_2(%arg0: i32, %arg1: i32) -> (i32, i32, i32, i32) {
    %c0_i32 = arith.constant 0 : i32
    %c0_i32_0 = arith.constant 0 : i32
    %c0_i32_1 = arith.constant 0 : i32
    return %arg0, %c0_i32, %arg1, %c0_i32_0 : i32, i32, i32, i32
  }
  func.func @transform_3(%arg0: i32, %arg1: i32) -> (i32, i32, i32, i32) {
    %c0_i32 = arith.constant 0 : i32
    %c0_i32_0 = arith.constant 0 : i32
    %c0_i32_1 = arith.constant 0 : i32
    return %arg0, %c0_i32, %arg1, %c0_i32_0 : i32, i32, i32, i32
  }
}

</mosaic_0001>

<bundles_post_ra>
// kernel: tpu_custom_call.1
= control target key start
LH: loop header
LB: loop body
LE: loop exit
PB: predicated region body
PF: predicated region fallthrough
CT: control target
= control target key end

     0   :  { %8 = vsyncpa [#allocation5], 0  ;;  %s361_s0 = inlined_call_operand.hbm [shape: f32[4], index: 0, kind: input, shape index: {}]   ;;  %s362_s1 = inlined_call_operand.vmem [shape: f32[4], index: 1, kind: input, shape index: {}]   ;;  %s363_s2 = inlined_call_operand.hbm [shape: f32[2,4,2,128], index: 2, kind: input, shape index: {}]   ;;  %s364_s3 = inlined_call_operand.hbm [shape: f32[2,4,2,128], index: 3, kind: output, shape index: {}]  }
   0x1   :  { %9 = vsyncpa [#allocation6], 0 }
   0x2   :  { %10 = vsyncpa [#allocation3], 0 }
   0x3   :  { %11 = vsyncpa [#allocation4], 0  ;;  %s26_s14 = sshll.u32 %s362_s1, 4  ;;  %s265_s15 = smov [#allocation2]   ;;  %s27_s14 = int_to_ptr.vmem [resolvable:$true] %s26_s14 }
   0x4   :  { %19 = dma.hbm_to_smem %s361_s0, 16, %s265_s15, [#allocation5]  }
   0x5   :  { %s205_s18 = scalar_lea.vmem %s27_s14, 16  ;;  %p210_p1 = scmp.lt.s32.totalorder %s27_s14, %s27_s14 }
   0x6   :  { %p206_p0 = scmp.ne.s32.totalorder %s27_s14, %s205_s18  ;;  %p211_p2 = scmp.lt.s32.totalorder %s205_s18, %s205_s18 }
   0x8   :  { %p212_p3 = por %p211_p2, %p210_p1 }
   0xa   :  { %p213_p4 = pnand %p212_p3, %p206_p0 }
   0xc   :  { %216 = shalt.err (!%p213_p4)
}
   0xd   :  { %s266_s19 = smov [#allocation7]   ;;  %s267_s20 = smov [#allocation8]  }
   0xe   :  { %29 = dma.vmem_to_smem %s27_s14, 16, %s266_s19, [#allocation6]  }
   0xf   :  { %s35_s21 = sshll.u32 %s267_s20, 4  ;;  %s36_s21 = int_to_ptr.vmem [resolvable:$true] %s35_s21 }
  0x10   :  { %s225_s22 = scalar_lea.vmem %s36_s21, 256  ;;  %p230_p6 = scmp.lt.s32.totalorder %s36_s21, %s36_s21 }
  0x11   :  { %p226_p5 = scmp.ne.s32.totalorder %s36_s21, %s225_s22  ;;  %p231_p7 = scmp.lt.s32.totalorder %s225_s22, %s225_s22 }
  0x13   :  { %p232_p8 = por %p231_p7, %p230_p6 }
  0x15   :  { %p233_p9 = pnand %p232_p8, %p226_p5 }
  0x17   :  { %236 = shalt.err (!%p233_p9)
}
  0x18   :  { %s268_s0 = smov 32   ;;  %s269_s1 = smov 2  }
  0x19   :  { %41 = dma.hbm_to_vmem [thread:$0]  %s363_s2, 256, %s36_s21, [#allocation3], %s268_s0, %s268_s0, %s269_s1  }
  0x1a   :  { %257 = dma.done.wait [#allocation5], 16  }
  0x1b   :  { %258 = vsyncadd [#allocation5], 4294967280 }
  0x1c   :  { %259 = dma.done.wait [#allocation6], 16  }
  0x1d   :  { %260 = vsyncadd [#allocation6], 4294967280 }
  0x1e   :  { %261 = dma.done.wait [#allocation3], 256  }
  0x1f   :  { %262 = vsyncadd [#allocation3], 4294967040 }
  0x20   :  { %51 = sfence }
  0x21   :  { %v52_v0 = vld [vmem:[#allocation8] sm:$0x3]  ;;  %v55_v1 = vld [vmem:[#allocation8 + $0x2] sm:$0x3]  ;;  %v60_v2 = vld [vmem:[#allocation8 + $0x4] sm:$0x3] }
  0x22   :  { %v57_v3 = vadd.f32 %v55_v1, %v52_v0  ;;  %v53_v4 = vld [vmem:[#allocation8 + $0x8] sm:$0x3]  ;;  %v65_v5 = vld [vmem:[#allocation8 + $0x6] sm:$0x3]  ;;  %v56_v6 = vld [vmem:[#allocation8 + $0xa] sm:$0x3] }
  0x23   :  { %v61_v7 = vld [vmem:[#allocation8 + $0xc] sm:$0x3]  ;;  %v58_v9 = vadd.f32 %v56_v6, %v53_v4  ;;  %v66_v10 = vld [vmem:[#allocation8 + $0xe] sm:$0x3]  ;;  %s323_s2 = sld [smem:[#allocation2]]  ;;  %s270_s5 = smov [#allocation9]  }
  0x24   :  { %v62_v8 = vadd.f32 %v60_v2, %v57_v3  ;;  %s325_s25 = sld [smem:[#allocation2 + $0x1]]  ;;  %v111_v42 = vld [vmem:[#allocation8 + $0x2] sm:$0x3]  ;;  %v128_v43 = vld [vmem:[#allocation8 + $0x4] sm:$0x3]  ;;  %s167_s6 = sshll.u32 %s270_s5, 4  ;;  %s168_s6 = int_to_ptr.vmem [resolvable:$true] %s167_s6 }
  0x25   :  { %v63_v12 = vadd.f32 %v61_v7, %v58_v9  ;;  %s327_s26 = sld [smem:[#allocation2 + $0x2]]  ;;  %v145_v44 = vld [vmem:[#allocation8 + $0x6] sm:$0x3]  ;;  %v112_v45 = vld [vmem:[#allocation8 + $0xa] sm:$0x3]  ;;  %s237_s7 = scalar_lea.vmem %s168_s6, 256 }
  0x26   :  { %v67_v11 = vadd.f32 %v65_v5, %v62_v8  ;;  %s329_s27 = sld [smem:[#allocation2 + $0x3]]  ;;  %v129_v52 = vld [vmem:[#allocation8 + $0xc] sm:$0x3]  ;;  %v146_v54 = vld [vmem:[#allocation8 + $0xe] sm:$0x3]  ;;  %p238_p10 = scmp.ne.s32.totalorder %s168_s6, %s237_s7 }
  0x27   :  { %v68_v14 = vadd.f32 %v66_v10, %v63_v12  ;;  %s331_s28 = sld [smem:[#allocation7]]  ;;  %p242_p11 = scmp.lt.s32.totalorder %s168_s6, %s168_s6 }
  0x28   :  { %v303_v13 = vmul.f32 0.25, %v67_v11  ;;  %s333_s29 = sld [smem:[#allocation7 + $0x1]]  ;;  %p243_p12 = scmp.lt.s32.totalorder %s237_s7, %s237_s7 }
  0x29   :  { %v311_v19 = vmul.f32 0.25, %v68_v14  ;;  %s335_s30 = sld [smem:[#allocation7 + $0x2]]  ;;  %v100_v46 = vstv %s323_s2 }
  0x2a   :  { %v306_v15 = vsub.f32 %v52_v0, %v303_v13  ;;  %v75_v16 = vsub.f32 %v55_v1, %v303_v13  ;;  %v81_v17 = vsub.f32 %v60_v2, %v303_v13  ;;  %v87_v18 = vsub.f32 %v65_v5, %v303_v13  ;;  %s337_s4 = sld [smem:[#allocation7 + $0x3]]  ;;  %p244_p13 = por %p243_p12, %p242_p11 }
  0x2b   :  { %v316_v23 = vsub.f32 %v53_v4, %v311_v19  ;;  %v76_v24 = vsub.f32 %v56_v6, %v311_v19  ;;  %v82_v25 = vsub.f32 %v61_v7, %v311_v19  ;;  %v88_v26 = vsub.f32 %v66_v10, %v311_v19 }
  0x2c   :  { %v73_v20 = vmul.f32 %v306_v15, %v306_v15  ;;  %v77_v21 = vmul.f32 %v75_v16, %v75_v16  ;;  %v83_v22 = vmul.f32 %v81_v17, %v81_v17  ;;  %v89_v28 = vmul.f32 %v87_v18, %v87_v18  ;;  %p245_p0 = pnand %p244_p13, %p238_p10 }
  0x2d   :  { %v74_v29 = vmul.f32 %v316_v23, %v316_v23  ;;  %v78_v30 = vmul.f32 %v76_v24, %v76_v24  ;;  %v84_v31 = vmul.f32 %v82_v25, %v82_v25  ;;  %v90_v34 = vmul.f32 %v88_v26, %v88_v26 }
  0x2e   :  { %v79_v27 = vadd.f32 %v77_v21, %v73_v20  ;;  %v116_v47 = vstv %s325_s25  ;;  %v133_v48 = vstv %s327_s26  ;;  %v150_v49 = vstv %s329_s27 }
  0x2f   :  { %v80_v33 = vadd.f32 %v78_v30, %v74_v29  ;;  %v113_v50 = vsub.f32 %v111_v42, %v303_v13  ;;  %v130_v51 = vsub.f32 %v128_v43, %v303_v13  ;;  %v147_v53 = vsub.f32 %v145_v44, %v303_v13 }
  0x30   :  { %v85_v32 = vadd.f32 %v83_v22, %v79_v27  ;;  %v106_v56 = vstv %s331_s28  ;;  %v122_v57 = vstv %s333_s29  ;;  %v114_v58 = vsub.f32 %v112_v45, %v311_v19 }
  0x31   :  { %v86_v36 = vadd.f32 %v84_v31, %v80_v33  ;;  %v139_v63 = vstv %s335_s30  ;;  %v131_v0 = vsub.f32 %v129_v52, %v311_v19  ;;  %v156_v1 = vstv %s337_s4 }
  0x32   :  { %v91_v35 = vadd.f32 %v89_v28, %v85_v32  ;;  %v148_v2 = vsub.f32 %v146_v54, %v311_v19 }
  0x33   :  { %v92_v38 = vadd.f32 %v90_v34, %v86_v36 }
  0x34   :  { %v93_v37 = vmul.f32 0.25, %v91_v35 }
  0x35   :  { %v94_v40 = vmul.f32 0.25, %v92_v38 }
  0x36   :  { %v95_v39 = vadd.f32 1e-05, %v93_v37 }
  0x37   :  { %v96_v41 = vadd.f32 1e-05, %v94_v40 }
  0x38   :  { %193 = vrsqrt.f32 %v95_v39 }
  0x39   :  { %195 = vrsqrt.f32 %v96_v41 }
  0x45   :  { %v194_v55 = vpop.eup %193 }
  0x46   :  { %v101_v59 = vmul.f32 %v194_v55, %v100_v46  ;;  %v117_v60 = vmul.f32 %v194_v55, %v116_v47  ;;  %v134_v61 = vmul.f32 %v194_v55, %v133_v48  ;;  %v151_v62 = vmul.f32 %v194_v55, %v150_v49  ;;  %v196_v3 = vpop.eup %195 }
  0x47   :  { %v102_v8 = vmul.f32 %v196_v3, %v100_v46  ;;  %v118_v9 = vmul.f32 %v196_v3, %v116_v47  ;;  %v135_v10 = vmul.f32 %v196_v3, %v133_v48  ;;  %v152_v11 = vmul.f32 %v196_v3, %v150_v49 }
  0x48   :  { %v103_v4 = vmul.f32 %v101_v59, %v306_v15  ;;  %v119_v5 = vmul.f32 %v117_v60, %v113_v50  ;;  %v136_v6 = vmul.f32 %v134_v61, %v130_v51  ;;  %v153_v7 = vmul.f32 %v151_v62, %v147_v53 }
  0x49   :  { %v104_v17 = vmul.f32 %v102_v8, %v316_v23  ;;  %v120_v18 = vmul.f32 %v118_v9, %v114_v58  ;;  %v137_v19 = vmul.f32 %v135_v10, %v131_v0  ;;  %v154_v20 = vmul.f32 %v152_v11, %v148_v2 }
  0x4a   :  { %v107_v12 = vadd.f32 %v106_v56, %v103_v4  ;;  %v123_v13 = vadd.f32 %v122_v57, %v119_v5  ;;  %v140_v14 = vadd.f32 %v139_v63, %v136_v6  ;;  %v157_v16 = vadd.f32 %v156_v1, %v153_v7 }
  0x4b   :  { %v108_v15 = vadd.f32 %v106_v56, %v104_v17  ;;  %v124_v21 = vadd.f32 %v122_v57, %v120_v18  ;;  %v141_v22 = vadd.f32 %v139_v63, %v137_v19  ;;  %v158_v24 = vadd.f32 %v156_v1, %v154_v20 }
  0x4c   :  { %109 = vst [vmem:[#allocation9] sm:$0x3] %v107_v12  ;;  %126 = vst [vmem:[#allocation9 + $0x2] sm:$0x3] %v123_v13 }
  0x4d   :  { %143 = vst [vmem:[#allocation9 + $0x4] sm:$0x3] %v140_v14  ;;  %160 = vst [vmem:[#allocation9 + $0x6] sm:$0x3] %v157_v16 }
  0x4e   :  { %110 = vst [vmem:[#allocation9 + $0x8] sm:$0x3] %v108_v15  ;;  %127 = vst [vmem:[#allocation9 + $0xa] sm:$0x3] %v124_v21 }
  0x4f   :  { %144 = vst [vmem:[#allocation9 + $0xc] sm:$0x3] %v141_v22  ;;  %161 = vst [vmem:[#allocation9 + $0xe] sm:$0x3] %v158_v24 }
  0x50   :  { %248 = shalt.err (!%p245_p0)
}
  0x51   :  { %173 = dma.vmem_to_hbm [thread:$0]  %s168_s6, 256, %s364_s3, [#allocation4], %s268_s0, %s268_s0, %s269_s1  }
  0x52   :  { %263 = dma.done.wait [#allocation4], 256  }
  0x53   :  { %264 = vsyncadd [#allocation4], 4294967040 }
  0x54   :  { %177 = vsyncpa [#allocation3], 1 }
  0x55   :  { %178 = vsyncpa [#allocation4], 1 }
  0x56   :  { %179 = vsyncpa [#allocation5], 1 }
  0x57   :  { %180 = vsyncpa [#allocation6], 1 }

</bundles_post_ra>
